<compile_context>
chip_gen: v6e
topology: v6e:2x2x1
jax: 0.10.0
libtpu: 0.0.40
codegen_flags: <defaults>
</compile_context>

<pallas_src>
import functools

import jax
import jax.numpy as jnp
from jax.experimental import pallas as pl
from jax.experimental.pallas import tpu as pltpu

_SQRT_2_OVER_PI = 0.7978845608028654  # sqrt(2/pi)


def _mlp_kernel(x_ref, w1_ref, b1_ref, w2_ref, b2_ref, o_ref, acc_ref):
    # x_ref : (tm, D) bf16      w1_ref: (D, th) bf16      b1_ref: (1, th) f32
    # w2_ref: (th, D) bf16      b2_ref: (1, D)  f32
    # o_ref : (tm, D) out dtype acc_ref: (tm, D) f32 accumulator over H chunks
    h_idx = pl.program_id(1)

    @pl.when(h_idx == 0)
    def _init():
        acc_ref[...] = jnp.zeros_like(acc_ref)

    # c_fc chunk: bf16 operands, f32 MXU accumulation.
    h = jnp.dot(x_ref[...], w1_ref[...], preferred_element_type=jnp.float32)
    h = h + b1_ref[...]

    # GELU(approximate='tanh') in f32:
    #   0.5 * x * (1 + tanh(sqrt(2/pi) * (x + 0.044715 * x^3)))
    # tanh lowers to the EUP (its own bundle slot), so this is nearly free next to
    # the two MXU matmuls.
    g = 0.5 * h * (1.0 + jnp.tanh(_SQRT_2_OVER_PI * (h + 0.044715 * h * h * h)))

    # Partial c_proj: accumulate this H-chunk's (tm, D) contribution.
    acc_ref[...] += jnp.dot(
        g.astype(jnp.bfloat16), w2_ref[...], preferred_element_type=jnp.float32
    )

    @pl.when(h_idx == pl.num_programs(1) - 1)
    def _finalize():
        o_ref[...] = (acc_ref[...] + b2_ref[...]).astype(o_ref.dtype)


def _footprint_bytes(tm, th, D):
    """Approximate per-step VMEM footprint (double-buffered streams + scratch)."""
    return (
        2 * tm * D * 2            # x tile (bf16), double-buffered
        + 2 * D * th * 2          # W1 column slab (bf16), double-buffered
        + 2 * th * D * 2          # W2 row slab (bf16), double-buffered
        + 2 * th * 4 + 2 * D * 4  # biases (f32), double-buffered
        + 2 * tm * D * 4          # output tile, double-buffered
        + tm * D * 4              # f32 accumulator scratch
        + 2 * tm * th * 4         # h / g f32 intermediates (live registers/VMEM)
    )


def _select_tiles(M, D, H):
    """Largest (tm, th) whose footprint fits a conservative VMEM budget."""
    budget = 44 << 20  # leave headroom under v7x's 64 MiB scoped VMEM
    tm_cands = [c for c in (1024, 512, 256, 128, 64, 32, 16, 8) if M % c == 0] or [M]
    th_cands = [c for c in (4096, 3072, 2048, 1536, 1024, 768, 512, 256, 128)
                if H % c == 0] or [H]
    for tm in tm_cands:
        for th in th_cands:
            if _footprint_bytes(tm, th, D) <= budget:
                return tm, th
    return tm_cands[-1], th_cands[-1]


@functools.partial(jax.jit, static_argnames=("tm", "th"))
def _mlp_pallas_impl(x2d, w1, b1, w2, b2, *, tm, th):
    M, D = x2d.shape
    H = w1.shape[1]

    # MXU operands in bf16 (halves weight/activation HBM traffic and VMEM residency);
    # biases stay f32 and all accumulation / elementwise math is f32.
    x_bf = x2d.astype(jnp.bfloat16)
    w1_bf = w1.astype(jnp.bfloat16)
    w2_bf = w2.astype(jnp.bfloat16)
    b1_2d = b1.reshape(1, H).astype(jnp.float32)
    b2_2d = b2.reshape(1, D).astype(jnp.float32)

    grid = (M // tm, H // th)

    # VMEM budget from the actual tile footprint, with headroom; clamp for portability
    # (v7x has 64 MiB physical VMEM per TensorCore).
    vmem_limit = int(min(max(2 * _footprint_bytes(tm, th, D), 32 << 20), 60 << 20))

    weight_passes = (M // tm) if H > th else 1  # weights stay resident when th == H
    cost = pl.CostEstimate(
        flops=4 * M * D * H,                   # two matmuls: 2*M*D*H each
        transcendentals=M * H,                 # tanh
        bytes_accessed=(
            x_bf.size * 2 + M * D * 4
            + (w1_bf.size * 2 + w2_bf.size * 2 + H * 4 + D * 4) * weight_passes
        ),
    )

    return pl.pallas_call(
        _mlp_kernel,
        out_shape=jax.ShapeDtypeStruct((M, D), x2d.dtype),
        grid_spec=pltpu.PrefetchScalarGridSpec(
            num_scalar_prefetch=0,
            grid=grid,
            in_specs=[
                pl.BlockSpec((tm, D), lambda i, h: (i, 0)),   # x tile (const over h)
                pl.BlockSpec((D, th), lambda i, h: (0, h)),   # W1 column slab
                pl.BlockSpec((1, th), lambda i, h: (0, h)),   # b1 slab
                pl.BlockSpec((th, D), lambda i, h: (h, 0)),   # W2 row slab
                pl.BlockSpec((1, D), lambda i, h: (0, 0)),    # b2 (resident)
            ],
            out_specs=pl.BlockSpec((tm, D), lambda i, h: (i, 0)),
            scratch_shapes=[pltpu.VMEM((tm, D), jnp.float32)],
        ),
        compiler_params=pltpu.CompilerParams(
            dimension_semantics=("parallel", "arbitrary"),
            vmem_limit_bytes=vmem_limit,
        ),
        cost_estimate=cost,
    )(x_bf, w1_bf, b1_2d, w2_bf, b2_2d)


def mlp_pallas(x, w1, b1, w2, b2):
    """MLP forward over the leading dims of x. w1:(D,H), b1:(H,), w2:(H,D), b2:(D,)."""
    D = x.shape[-1]
    H = w1.shape[1]
    x2d = x.reshape(-1, D)
    M = x2d.shape[0]
    tm, th = _select_tiles(M, D, H)
    out2d = _mlp_pallas_impl(x2d, w1, b1, w2, b2, tm=tm, th=th)
    return out2d.reshape(x.shape)


if __name__ == "__main__":
    # Small config: batch=2, seq=8, n_embd=32 -> hidden = 4 * 32 = 128
    B, T, D = 2, 8, 32
    H = 4 * D

    key = jax.random.PRNGKey(0)
    kx, kw1, kb1, kw2, kb2 = jax.random.split(key, 5)

    x = jax.random.normal(kx, (B, T, D), dtype=jnp.float32)
    # Deterministic synthetic params; (in, out) layout == nn.Linear weight transposed.
    w1 = jax.random.normal(kw1, (D, H), dtype=jnp.float32) * 0.02   # c_fc weight
    b1 = jax.random.normal(kb1, (H,), dtype=jnp.float32) * 0.02     # c_fc bias
    w2 = jax.random.normal(kw2, (H, D), dtype=jnp.float32) * 0.02   # c_proj weight
    b2 = jax.random.normal(kb2, (D,), dtype=jnp.float32) * 0.02     # c_proj bias

    out = mlp_pallas(x, w1, b1, w2, b2)
    jax.block_until_ready(out)

    # Pure-JAX f32 reference (same semantics as the PyTorch module). Tolerance is
    # loosened because the kernel feeds the MXU bf16 operands (f32 accumulation).
    def gelu_tanh(v):
        return 0.5 * v * (1.0 + jnp.tanh(jnp.sqrt(2.0 / jnp.pi) * (v + 0.044715 * v ** 3)))

    x2d = x.reshape(-1, D)
    ref = (gelu_tanh(x2d @ w1 + b1[None, :]) @ w2 + b2[None, :]).reshape(B, T, D)
    assert jnp.allclose(out, ref, atol=1e-2, rtol=5e-2), "mismatch vs reference"

    print("KERNEL_OK")
</pallas_src>

<mosaic_0001>
module attributes {stable_mosaic.version = 11 : i64} {
  func.func @_mlp_kernel(%arg0: i32, %arg1: i32, %arg2: memref<16x32xbf16, #tpu.memory_space<vmem>>, %arg3: memref<32x128xbf16, #tpu.memory_space<vmem>>, %arg4: memref<1x128xf32, #tpu.memory_space<vmem>>, %arg5: memref<128x32xbf16, #tpu.memory_space<vmem>>, %arg6: memref<1x32xf32, #tpu.memory_space<vmem>>, %arg7: memref<16x32xf32, #tpu.memory_space<vmem>>, %arg8: memref<16x32xf32, #tpu.memory_space<vmem>>) attributes {dimension_semantics = [#tpu.dimension_semantics<parallel>, #tpu.dimension_semantics<arbitrary>], iteration_bounds = array<i64: 1, 1>, scalar_prefetch = 0 : i64, scratch_operands = 1 : i64, tpu.core_type = #tpu.core_type<tc>, window_params = [{transform_indices = @transform_0, window_bounds = array<i64: 16, 32>}, {transform_indices = @transform_1, window_bounds = array<i64: 32, 128>}, {transform_indices = @transform_2, window_bounds = array<i64: 1, 128>}, {transform_indices = @transform_3, window_bounds = array<i64: 128, 32>}, {pipeline_mode = #tpu.pipeline_mode<synchronous>, transform_indices = @transform_4, window_bounds = array<i64: 1, 32>}, {transform_indices = @transform_5, window_bounds = array<i64: 16, 32>}]} {
    %c0_i32 = arith.constant 0 : i32
    %0 = arith.cmpi eq, %arg1, %c0_i32 : i32
    %1 = arith.extui %0 : i1 to i32
    %c0_i32_0 = arith.constant 0 : i32
    %2 = arith.cmpi ne, %1, %c0_i32_0 : i32
    scf.if %2 {
      %cst_19 = arith.constant 0.000000e+00 : f32
      %31 = vector.broadcast %cst_19 : f32 to vector<16x32xf32>
      %c0_20 = arith.constant 0 : index
      %c0_21 = arith.constant 0 : index
      %32 = vector.load %arg8[%c0_20, %c0_21] : memref<16x32xf32, #tpu.memory_space<vmem>>, vector<16x32xf32>
      tpu.vector_store %arg8[%c0_20, %c0_21], %31 {strides = array<i32>} : memref<16x32xf32, #tpu.memory_space<vmem>>, vector<16x32xf32>,
    } else {
    }
    %c0 = arith.constant 0 : index
    %c0_1 = arith.constant 0 : index
    %3 = vector.load %arg2[%c0, %c0_1] : memref<16x32xbf16, #tpu.memory_space<vmem>>, vector<16x32xbf16>
    %c0_2 = arith.constant 0 : index
    %c0_3 = arith.constant 0 : index
    %4 = vector.load %arg3[%c0_2, %c0_3] : memref<32x128xbf16, #tpu.memory_space<vmem>>, vector<32x128xbf16>
    %cst = arith.constant dense<0.000000e+00> : vector<16x128xf32>
    %5 = tpu.matmul %3, %4, %cst {dimension_numbers = #tpu.dot_dimension_numbers<[1], [0], [0], [1], [0, 0, 1, 1], [], []>} : vector<16x32xbf16>, vector<32x128xbf16>, vector<16x128xf32> -> vector<16x128xf32>
    %c0_4 = arith.constant 0 : index
    %c0_5 = arith.constant 0 : index
    %6 = vector.load %arg4[%c0_4, %c0_5] : memref<1x128xf32, #tpu.memory_space<vmem>>, vector<1x128xf32>
    %7 = vector.broadcast %6 : vector<1x128xf32> to vector<16x128xf32>
    %8 = arith.addf %5, %7 : vector<16x128xf32>
    %cst_6 = arith.constant 5.000000e-01 : f32
    %9 = vector.broadcast %cst_6 : f32 to vector<16x128xf32>
    %10 = arith.mulf %9, %8 : vector<16x128xf32>
    %cst_7 = arith.constant 4.471500e-02 : f32
    %11 = vector.broadcast %cst_7 : f32 to vector<16x128xf32>
    %12 = arith.mulf %11, %8 : vector<16x128xf32>
    %13 = arith.mulf %12, %8 : vector<16x128xf32>
    %14 = arith.mulf %13, %8 : vector<16x128xf32>
    %15 = arith.addf %8, %14 : vector<16x128xf32>
    %cst_8 = arith.constant 0.797884583 : f32
    %16 = vector.broadcast %cst_8 : f32 to vector<16x128xf32>
    %17 = arith.mulf %16, %15 : vector<16x128xf32>
    %18 = math.tanh %17 : vector<16x128xf32>
    %cst_9 = arith.constant 1.000000e+00 : f32
    %19 = vector.broadcast %cst_9 : f32 to vector<16x128xf32>
    %20 = arith.addf %19, %18 : vector<16x128xf32>
    %21 = arith.mulf %10, %20 : vector<16x128xf32>
    %c0_10 = arith.constant 0 : index
    %c0_11 = arith.constant 0 : index
    %22 = vector.load %arg8[%c0_10, %c0_11] : memref<16x32xf32, #tpu.memory_space<vmem>>, vector<16x32xf32>
    %23 = arith.truncf %21 : vector<16x128xf32> to vector<16x128xbf16>
    %c0_12 = arith.constant 0 : index
    %c0_13 = arith.constant 0 : index
    %24 = vector.load %arg5[%c0_12, %c0_13] : memref<128x32xbf16, #tpu.memory_space<vmem>>, vector<128x32xbf16>
    %cst_14 = arith.constant dense<0.000000e+00> : vector<16x32xf32>
    %25 = tpu.matmul %23, %24, %cst_14 {dimension_numbers = #tpu.dot_dimension_numbers<[1], [0], [0], [1], [0, 0, 1, 1], [], []>} : vector<16x128xbf16>, vector<128x32xbf16>, vector<16x32xf32> -> vector<16x32xf32>
    %26 = arith.addf %22, %25 : vector<16x32xf32>
    %c0_15 = arith.constant 0 : index
    %c0_16 = arith.constant 0 : index
    %27 = vector.load %arg8[%c0_15, %c0_16] : memref<16x32xf32, #tpu.memory_space<vmem>>, vector<16x32xf32>
    tpu.vector_store %arg8[%c0_15, %c0_16], %26 {strides = array<i32>} : memref<16x32xf32, #tpu.memory_space<vmem>>, vector<16x32xf32>,
    %c0_i32_17 = arith.constant 0 : i32
    %28 = arith.cmpi eq, %arg1, %c0_i32_17 : i32
    %29 = arith.extui %28 : i1 to i32
    %c0_i32_18 = arith.constant 0 : i32
    %30 = arith.cmpi ne, %29, %c0_i32_18 : i32
    scf.if %30 {
      %c0_19 = arith.constant 0 : index
      %c0_20 = arith.constant 0 : index
      %31 = vector.load %arg8[%c0_19, %c0_20] : memref<16x32xf32, #tpu.memory_space<vmem>>, vector<16x32xf32>
      %c0_21 = arith.constant 0 : index
      %c0_22 = arith.constant 0 : index
      %32 = vector.load %arg6[%c0_21, %c0_22] : memref<1x32xf32, #tpu.memory_space<vmem>>, vector<1x32xf32>
      %33 = vector.broadcast %32 : vector<1x32xf32> to vector<16x32xf32>
      %34 = arith.addf %31, %33 : vector<16x32xf32>
      %c0_23 = arith.constant 0 : index
      %c0_24 = arith.constant 0 : index
      %35 = vector.load %arg7[%c0_23, %c0_24] : memref<16x32xf32, #tpu.memory_space<vmem>>, vector<16x32xf32>
      tpu.vector_store %arg7[%c0_23, %c0_24], %34 {strides = array<i32>} : memref<16x32xf32, #tpu.memory_space<vmem>>, vector<16x32xf32>,
    } else {
    }
    return
  }
  func.func @transform_0(%arg0: i32, %arg1: i32) -> (i32, i32) {
    %c0_i32 = arith.constant 0 : i32
    %c0_i32_0 = arith.constant 0 : i32
    return %arg0, %c0_i32 : i32, i32
  }
  func.func @transform_1(%arg0: i32, %arg1: i32) -> (i32, i32) {
    %c0_i32 = arith.constant 0 : i32
    %c0_i32_0 = arith.constant 0 : i32
    return %c0_i32, %arg1 : i32, i32
  }
  func.func @transform_2(%arg0: i32, %arg1: i32) -> (i32, i32) {
    %c0_i32 = arith.constant 0 : i32
    %c0_i32_0 = arith.constant 0 : i32
    return %c0_i32, %arg1 : i32, i32
  }
  func.func @transform_3(%arg0: i32, %arg1: i32) -> (i32, i32) {
    %c0_i32 = arith.constant 0 : i32
    %c0_i32_0 = arith.constant 0 : i32
    return %arg1, %c0_i32 : i32, i32
  }
  func.func @transform_4(%arg0: i32, %arg1: i32) -> (i32, i32) {
    %c0_i32 = arith.constant 0 : i32
    %c0_i32_0 = arith.constant 0 : i32
    %c0_i32_1 = arith.constant 0 : i32
    return %c0_i32, %c0_i32_0 : i32, i32
  }
  func.func @transform_5(%arg0: i32, %arg1: i32) -> (i32, i32) {
    %c0_i32 = arith.constant 0 : i32
    %c0_i32_0 = arith.constant 0 : i32
    return %arg0, %c0_i32 : i32, i32
  }
}

</mosaic_0001>

<bundles_post_ra>
// kernel: _mlp_pallas_impl.1
= control target key start
LH: loop header
LB: loop body
LE: loop exit
PB: predicated region body
PF: predicated region fallthrough
CT: control target
= control target key end

     0   :  { %v362_v1 = vmov 0.0   ;;  %vm363_vm0 = vmmov 0   ;;  %vm26_vm1 = vcmask 261120   ;;  %s446_s0 = inlined_call_operand.vmem [shape: bf16[16,32], index: 0, kind: input, shape index: {}]   ;;  %s447_s1 = inlined_call_operand.vmem [shape: bf16[32,128], index: 1, kind: input, shape index: {}]   ;;  %s448_s2 = inlined_call_operand.vmem [shape: f32[1,128], index: 2, kind: input, shape index: {}]   ;;  %s449_s3 = inlined_call_operand.vmem [shape: bf16[128,32], index: 3, kind: input, shape index: {}]   ;;  %s450_s4 = inlined_call_operand.vmem [shape: f32[1,32], index: 4, kind: input, shape index: {}]   ;;  %s451_s5 = inlined_call_operand.hbm [shape: f32[16,32], index: 5, kind: output, shape index: {}]  }
   0x1   :  { %v325_v0 = vld [vmem:[%s447_s1 + $0x8] sm:$0xff]   ;;  %292 = vmatprep.subr.bf16.mxu0 %v362_v1  ;;  %300 = vmatprep.subr.bf16.mxu1 %v362_v1  ;;  %v326_v2 = vld [vmem:[%s447_s1] sm:$0xff]   ;;  %27 = vst.msk [vmem:[#allocation2] sm:$0xff] %vm26_vm1, %v362_v1  ;;  %28 = vst.msk [vmem:[#allocation2 + $0x8] sm:$0xff] %vm26_vm1, %v362_v1 }
   0x2   :  { %293 = vmatpush3.bf16.msra.mxu0 %v325_v0  ;;  %296 = vmatprep.mubr.msk.bf16.mxu0 %vm363_vm0, %v362_v1  ;;  %v327_v3 = vld [vmem:[%s446_s0] sm:$0xff]  }
   0x3   :  { %294 = vmatprep.subr.bf16.mxu0 %v362_v1  ;;  %316 = vmatprep.mubr.msk.bf16.mxu1 %vm363_vm0, %v362_v1 }
   0x6   :  { %295 = vmatpush3.bf16.msra.mxu0 %v326_v2 }
   0x7   :  { %10 = vsyncpa [#allocation4], 0  ;;  %v328_v4 = vld [vmem:[%s449_s3 + $0x38] sm:$0xff]   ;;  %v329_v5 = vld [vmem:[%s449_s3 + $0x30] sm:$0xff]   ;;  %s364_s15 = smov [#allocation3]  }
   0x8   :  { %301 = vmatpush3.bf16.msra.mxu1 %v328_v4  ;;  %v330_v6 = vld [vmem:[%s449_s3 + $0x28] sm:$0xff]   ;;  %v331_v7 = vld [vmem:[%s449_s3 + $0x20] sm:$0xff]   ;;  %v332_v8 = vld [vmem:[%s449_s3 + $0x18] sm:$0xff]   ;;  %s255_s16 = sshll.u32 %s364_s15, 4  ;;  %s256_s16 = int_to_ptr.vmem [resolvable:$true] %s255_s16 }
   0x9   :  { %297 = vmatmul.mubr.msk.bf16.vlgmr.msra.gmra.mxu0 %vm26_vm1, %v327_v3  ;;  %302 = vmatprep.subr.bf16.mxu1 %v362_v1  ;;  %v333_v9 = vld [vmem:[%s449_s3 + $0x10] sm:$0xff]   ;;  %v334_v10 = vld [vmem:[%s449_s3 + $0x8] sm:$0xff]   ;;  %v335_v11 = vld [vmem:[%s449_s3] sm:$0xff]   ;;  %s340_s17 = scalar_lea.vmem %s256_s16, 256  ;;  %p345_p1 = scmp.lt.s32.totalorder %s256_s16, %s256_s16 }
   0xa   :  { %v266_v12 = vld [vmem:[%s448_s2] ss:$0 sm:$0xff]  ;;  %v123_v42 = vld [vmem:[#allocation2 + $0x8] sm:$0xff]  ;;  %p341_p0 = scmp.ne.s32.totalorder %s256_s16, %s340_s17  ;;  %p346_p2 = scmp.lt.s32.totalorder %s340_s17, %s340_s17 }
   0xb   :  { %v122_v38 = vld [vmem:[#allocation2] sm:$0xff] }
   0xc   :  { %303 = vmatpush3.bf16.msra.mxu1 %v329_v5  ;;  %v279_v46 = vld [vmem:[%s450_s4] ss:$0 sm:$0xff]  ;;  %p347_p3 = por %p346_p2, %p345_p1 }
   0xd   :  { %304 = vmatprep.subr.bf16.mxu1 %v362_v1 }
   0xe   :  { %p348_p4 = pnand %p347_p3, %p341_p0 }
  0x10   :  { %305 = vmatpush3.bf16.msra.mxu1 %v330_v6 }
  0x11   :  { %306 = vmatprep.subr.bf16.mxu1 %v362_v1 }
  0x14   :  { %307 = vmatpush3.bf16.msra.mxu1 %v331_v7 }
  0x15   :  { %308 = vmatprep.subr.bf16.mxu1 %v362_v1 }
  0x18   :  { %309 = vmatpush3.bf16.msra.mxu1 %v332_v8 }
  0x19   :  { %310 = vmatprep.subr.bf16.mxu1 %v362_v1 }
  0x1c   :  { %311 = vmatpush3.bf16.msra.mxu1 %v333_v9 }
  0x1d   :  { %312 = vmatprep.subr.bf16.mxu1 %v362_v1 }
  0x20   :  { %313 = vmatpush3.bf16.msra.mxu1 %v334_v10 }
  0x21   :  { %314 = vmatprep.subr.bf16.mxu1 %v362_v1 }
  0x24   :  { %315 = vmatpush3.bf16.msra.mxu1 %v335_v11 }
  0xc9   :  { %v97_v13 = vpop.f32.mrf.mxu0 }
  0xca   :  { %v98_v14 = vadd.f32 %v266_v12, %v97_v13 }
  0xcb   :  { %v298_v15 = vpop.f32.mrf.mxu0 }
  0xcc   :  { %v106_v16 = vmul.f32 0.044715, %v98_v14  ;;  %v104_v32 = vmul.f32 0.5, %v98_v14 }
  0xcd   :  { %v100_v17 = vpop.f32.mrf.mxu0 }
  0xce   :  { %v108_v18 = vmul.f32 %v106_v16, %v98_v14  ;;  %v101_v19 = vadd.f32 %v266_v12, %v100_v17 }
  0xcf   :  { %v299_v20 = vpop.f32.mrf.mxu0 }
  0xd0   :  { %v110_v21 = vmul.f32 %v108_v18, %v98_v14  ;;  %v107_v22 = vmul.f32 0.044715, %v101_v19  ;;  %v105_v33 = vmul.f32 0.5, %v101_v19 }
  0xd2   :  { %v109_v23 = vmul.f32 %v107_v22, %v101_v19  ;;  %v112_v24 = vadd.f32 %v110_v21, %v98_v14 }
  0xd4   :  { %v111_v25 = vmul.f32 %v109_v23, %v101_v19  ;;  %v114_v26 = vmul.f32 0.7978846, %v112_v24 }
  0xd6   :  { %v113_v27 = vadd.f32 %v111_v25, %v101_v19  ;;  %336 = vtanh.f32 %v114_v26 }
  0xd8   :  { %v115_v28 = vmul.f32 0.7978846, %v113_v27 }
  0xda   :  { %338 = vtanh.f32 %v115_v28 }
  0xe3   :  { %v337_v29 = vpop.eup %336 }
  0xe4   :  { %v118_v30 = vadd.f32 1.0, %v337_v29 }
  0xe6   :  { %v120_v35 = vmul.f32 %v118_v30, %v104_v32 }
  0xe7   :  { %v339_v31 = vpop.eup %338 }
  0xe8   :  { %v119_v34 = vadd.f32 1.0, %v339_v31 }
  0xea   :  { %v121_v36 = vmul.f32 %v119_v34, %v105_v33 }
  0xec   :  { %v124_v37 = vpack.c.bf16 %v121_v36, %v120_v35 }
  0xee   :  { %317 = vmatmul.mubr.bf16.vlgmr.msra.gmra.mxu1 %v124_v37 }
 0x1ae   :  { %v223_v39 = vpop.f32.mrf.mxu1 }
 0x1af   :  { %v230_v40 = vadd.f32 %v223_v39, %v122_v38 }
 0x1b0   :  { %v318_v41 = vpop.f32.mrf.mxu1 }
 0x1b1   :  { %232 = vst.msk [vmem:[#allocation2] sm:$0xff] %vm26_vm1, %v230_v40 }
 0x1b2   :  { %v226_v43 = vpop.f32.mrf.mxu1 }
 0x1b3   :  { %v231_v44 = vadd.f32 %v226_v43, %v123_v42 }
 0x1b4   :  { %v319_v45 = vpop.f32.mrf.mxu1 }
 0x1b5   :  { %233 = vst.msk [vmem:[#allocation2 + $0x8] sm:$0xff] %vm26_vm1, %v231_v44 }
 0x1b8   :  { %v237_v47 = vld [vmem:[#allocation2] sm:$0xff] }
 0x1b9   :  { %v246_v48 = vadd.f32 %v279_v46, %v237_v47 }
 0x1bb   :  { %248 = vst.msk [vmem:[#allocation3] sm:$0xff] %vm26_vm1, %v246_v48 }
 0x1bc   :  { %v238_v49 = vld [vmem:[#allocation2 + $0x8] sm:$0xff] }
 0x1bd   :  { %v247_v50 = vadd.f32 %v279_v46, %v238_v49 }
 0x1bf   :  { %249 = vst.msk [vmem:[#allocation3 + $0x8] sm:$0xff] %vm26_vm1, %v247_v50 }
 0x1c0   :  { %351 = shalt.err (!%p348_p4)
}
 0x1c1   :  { %s365_s18 = smov 128   ;;  %s366_s4 = smov 8  }
 0x1c2   :  { %261 = dma.vmem_to_hbm [thread:$0]  %s256_s16, 256, %s451_s5, [#allocation4], %s365_s18, %s365_s18, %s366_s4  }
 0x1c3   :  { %360 = dma.done.wait [#allocation4], 256  }
 0x1c4   :  { %361 = vsyncadd [#allocation4], 4294967040 }
 0x1c5   :  { %265 = vsyncpa [#allocation4], 1 }

</bundles_post_ra>
